<compile_context>
chip_gen: v5e
topology: v5e:2x2
jax: 0.10.0
libtpu: 0.0.40
codegen_flags: <defaults>
</compile_context>

<pallas_src>
import functools

import jax
import jax.numpy as jnp
from jax.experimental import pallas as pl
from jax.experimental.pallas import tpu as pltpu


def _gated_residual_compute(x, x_nxt, cnd, wx0_ref, wx1_ref, wc_ref, bgf_ref,
                            wrs_ref, brs_ref, res_ref, skip_ref, *,
                            dilation, tile_t, res_channels):
    """Shared per-tile body.  x: (Cr, XW), x_nxt: (Cr, XW) or None, cnd: (Cc, tile_t)."""
    Cr = res_channels
    f32 = jnp.float32

    # Dilated-conv taps (offsets 0 and `dilation`).  No big RHS concat: three
    # accumulated MXU dots instead (perf review: drop x_cat materialization).
    x_lo = x[:, :tile_t]
    if x_nxt is None:
        x_hi = x[:, dilation:dilation + tile_t]          # halo inside this block
    else:
        # halo crosses into the next time tile
        x_hi = jnp.concatenate([x[:, dilation:], x_nxt[:, :dilation]], axis=1)

    # gate rows [0, Cr), filter rows [Cr, 2Cr); f32 accumulation on the MXU.
    gf = jnp.dot(wx0_ref[...], x_lo, preferred_element_type=f32)
    gf = gf + jnp.dot(wx1_ref[...], x_hi, preferred_element_type=f32)
    gf = gf + jnp.dot(wc_ref[...], cnd, preferred_element_type=f32)
    gf = gf + bgf_ref[...]                               # (2Cr, 1) lane broadcast

    gate = gf[:Cr, :]
    filt = gf[Cr:, :]
    # sigmoid(g) == 0.5 * (1 + tanh(g / 2)): one EUP transcendental for the gate
    # path (matters on v5e where the single EUP can become the binding slot).
    out = jnp.tanh(filt) * (0.5 * (jnp.tanh(0.5 * gate) + 1.0))

    # Fused residual + skip 1x1 convs: rows [0,Cr) -> res, rows [Cr,Cr+Cs) -> skip.
    rs = jnp.dot(wrs_ref[...], out.astype(wrs_ref.dtype),
                 preferred_element_type=f32) + brs_ref[...]

    res_ref[0] = (rs[:Cr, :] + x_hi.astype(f32)).astype(res_ref.dtype)
    skip_ref[0] = rs[Cr:, :].astype(skip_ref.dtype)      # full-length, lane-dense


def _kernel_single(x_ref, c_ref, wx0, wx1, wc, bgf, wrs, brs, res_ref, skip_ref,
                   *, dilation, tile_t, res_channels):
    _gated_residual_compute(x_ref[0], None, c_ref[0], wx0, wx1, wc, bgf, wrs, brs,
                            res_ref, skip_ref, dilation=dilation, tile_t=tile_t,
                            res_channels=res_channels)


def _kernel_tiled(x_ref, xn_ref, c_ref, wx0, wx1, wc, bgf, wrs, brs, res_ref,
                  skip_ref, *, dilation, tile_t, res_channels):
    _gated_residual_compute(x_ref[0], xn_ref[0], c_ref[0], wx0, wx1, wc, bgf, wrs,
                            brs, res_ref, skip_ref, dilation=dilation,
                            tile_t=tile_t, res_channels=res_channels)


def residual_block(x, c, params, *, dilation, skip_size, max_tile_t=512):
    """x: (B, res_ch, T) NCT;  c: (B, cond_ch, T - dilation) NCT.

    Returns (res, skip) in NCT, matching the PyTorch module.  HBM I/O runs in
    x.dtype (pass bf16 activations for ~2x less HBM traffic); MXU accumulation
    and elementwise math are always f32.
    """
    B, Cr, T = x.shape
    t_out = T - dilation
    Cc = c.shape[1]
    Cs = params["w_skip"].shape[0]
    assert dilation >= 1 and T > dilation
    assert c.shape[2] == t_out, "conditioning length must equal T - dilation"
    assert 0 < skip_size <= t_out

    dt = x.dtype
    c = c.astype(dt)
    f32 = jnp.float32

    # --- host-side weight packing (PyTorch Conv1d layout (Cout, Cin, K)) ------
    # gate/filter stacked on output rows: rows [0,Cr)=gate, [Cr,2Cr)=filter.
    w_x0 = jnp.concatenate([params["w_gate"][:, :, 0],
                            params["w_filter"][:, :, 0]], axis=0).astype(dt)   # (2Cr, Cr)
    w_x1 = jnp.concatenate([params["w_gate"][:, :, 1],
                            params["w_filter"][:, :, 1]], axis=0).astype(dt)   # (2Cr, Cr)
    w_c = jnp.concatenate([params["w_cond_gate"][:, :, 0],
                           params["w_cond_filter"][:, :, 0]], axis=0).astype(dt)  # (2Cr, Cc)
    b_gf = jnp.concatenate([params["b_cond_gate"], params["b_cond_filter"]]
                           ).reshape(2 * Cr, 1).astype(f32)
    # res/skip fused on output rows: rows [0,Cr)=res, [Cr,Cr+Cs)=skip.
    w_rs = jnp.concatenate([params["w_res"][:, :, 0],
                            params["w_skip"][:, :, 0]], axis=0).astype(dt)      # (Cr+Cs, Cr)
    b_rs = jnp.concatenate([params["b_res"], params["b_skip"]]
                           ).reshape(Cr + Cs, 1).astype(f32)

    # --- time tiling -----------------------------------------------------------
    tile_cap = max(128, (max_tile_t // 128) * 128)        # lane-dense tiles
    tile_cap = max(tile_cap, (dilation // 128 + 1) * 128)  # halo fits in 1 neighbour block
    if t_out <= tile_cap:
        tiled, tile_t, num_t = False, t_out, 1             # whole-sequence tile
    else:
        tiled, tile_t, num_t = True, tile_cap, pl.cdiv(t_out, tile_cap)

    def wfull(arr):   # small packed weights: whole array, constant index (DMA elided)
        return pl.BlockSpec(arr.shape, lambda b, j: (0, 0))

    c_spec = pl.BlockSpec((1, Cc, tile_t), lambda b, j: (b, 0, j))
    weight_specs = [wfull(w_x0), wfull(w_x1), wfull(w_c),
                    wfull(b_gf), wfull(w_rs), wfull(b_rs)]
    weights = (w_x0, w_x1, w_c, b_gf, w_rs, b_rs)
    out_specs = [pl.BlockSpec((1, Cr, tile_t), lambda b, j: (b, 0, j)),
                 pl.BlockSpec((1, Cs, tile_t), lambda b, j: (b, 0, j))]

    if not tiled:
        kernel = functools.partial(_kernel_single, dilation=dilation,
                                   tile_t=tile_t, res_channels=Cr)
        in_specs = [pl.BlockSpec((1, Cr, T), lambda b, j: (b, 0, 0)),
                    c_spec, *weight_specs]
        args = (x, c, *weights)
    else:
        n_xb = pl.cdiv(T, tile_t)
        kernel = functools.partial(_kernel_tiled, dilation=dilation,
                                   tile_t=tile_t, res_channels=Cr)
        # x passed twice (same HBM buffer): block j, and block j+1 for the halo.
        x_spec = pl.BlockSpec((1, Cr, tile_t), lambda b, j: (b, 0, j))
        xn_spec = pl.BlockSpec((1, Cr, tile_t),
                               lambda b, j: (b, 0, jnp.minimum(j + 1, n_xb - 1)))
        in_specs = [x_spec, xn_spec, c_spec, *weight_specs]
        args = (x, x, c, *weights)

    grid_spec = pltpu.PrefetchScalarGridSpec(
        num_scalar_prefetch=0,
        grid=(B, num_t),
        in_specs=in_specs,
        out_specs=out_specs,
    )

    res, skip_full = pl.pallas_call(
        kernel,
        out_shape=(jax.ShapeDtypeStruct((B, Cr, t_out), dt),
                   jax.ShapeDtypeStruct((B, Cs, t_out), dt)),
        grid_spec=grid_spec,
        # Both axes independent -> both "parallel" (time tiles shard across the
        # two v7x TensorCores even at B=1; no-op on single-TC v5e/v6e).
        compiler_params=pltpu.CompilerParams(
            dimension_semantics=("parallel", "parallel")),
    )(*args)

    # Tail slice done outside the kernel so in-kernel skip stores stay lane-dense.
    skip = skip_full[:, :, t_out - skip_size:]
    return res, skip


def _reference(x, c, params, *, dilation, skip_size):
    """Pure-JAX reference reproducing the PyTorch forward (NCT layout)."""
    T = x.shape[2]
    t_out = T - dilation
    x_lo, x_hi = x[:, :, :t_out], x[:, :, dilation:]

    def k2(w, a, b):   # dilated conv1d, kernel 2, no bias
        return (jnp.einsum('oi,bit->bot', w[:, :, 0], a)
                + jnp.einsum('oi,bit->bot', w[:, :, 1], b))

    def k1(w, bias, a):  # 1x1 conv with bias
        return jnp.einsum('oi,bit->bot', w[:, :, 0], a) + bias[None, :, None]

    gate = k2(params["w_gate"], x_lo, x_hi) + k1(params["w_cond_gate"],
                                                 params["b_cond_gate"], c)
    filt = k2(params["w_filter"], x_lo, x_hi) + k1(params["w_cond_filter"],
                                                   params["b_cond_filter"], c)
    out = jnp.tanh(filt) * jax.nn.sigmoid(gate)
    skip = k1(params["w_skip"], params["b_skip"], out)[:, :, -skip_size:]
    res = k1(params["w_res"], params["b_res"], out) + x_hi
    return res, skip


if __name__ == "__main__":
    B, res_ch, skip_ch, cond_ch = 2, 16, 16, 12

    key = jax.random.PRNGKey(0)
    ks = jax.random.split(key, 16)

    # Deterministic synthetic parameters (PyTorch Conv1d weight layout: Cout,Cin,K).
    params = {
        "w_gate":        0.1 * jax.random.normal(ks[0], (res_ch, res_ch, 2), jnp.float32),
        "w_filter":      0.1 * jax.random.normal(ks[1], (res_ch, res_ch, 2), jnp.float32),
        "w_cond_gate":   0.1 * jax.random.normal(ks[2], (res_ch, cond_ch, 1), jnp.float32),
        "b_cond_gate":   0.1 * jax.random.normal(ks[3], (res_ch,), jnp.float32),
        "w_cond_filter": 0.1 * jax.random.normal(ks[4], (res_ch, cond_ch, 1), jnp.float32),
        "b_cond_filter": 0.1 * jax.random.normal(ks[5], (res_ch,), jnp.float32),
        "w_res":         0.1 * jax.random.normal(ks[6], (res_ch, res_ch, 1), jnp.float32),
        "b_res":         0.1 * jax.random.normal(ks[7], (res_ch,), jnp.float32),
        "w_skip":        0.1 * jax.random.normal(ks[8], (skip_ch, res_ch, 1), jnp.float32),
        "b_skip":        0.1 * jax.random.normal(ks[9], (skip_ch,), jnp.float32),
    }

    # ---- test 1: small shapes, single-tile path, f32 I/O ---------------------
    T, dilation, skip_size = 16, 2, 8
    t_out = T - dilation
    x = jax.random.normal(ks[10], (B, res_ch, T), jnp.float32)       # NCT
    c = jax.random.normal(ks[11], (B, cond_ch, t_out), jnp.float32)  # NCT

    res, skip = residual_block(x, c, params, dilation=dilation, skip_size=skip_size)
    jax.block_until_ready((res, skip))
    res_ref, skip_ref = _reference(x, c, params, dilation=dilation, skip_size=skip_size)
    assert res.shape == (B, res_ch, t_out) and skip.shape == (B, skip_ch, skip_size)
    assert jnp.allclose(res, res_ref, atol=2e-5, rtol=2e-5)
    assert jnp.allclose(skip, skip_ref, atol=2e-5, rtol=2e-5)

    # ---- test 2: time-tiled path with cross-block halo, f32 I/O --------------
    T2, dil2, skip_size2 = 514, 2, 200          # t_out = 512, tile_t = 128 -> 4 tiles
    x2 = jax.random.normal(ks[12], (B, res_ch, T2), jnp.float32)
    c2 = jax.random.normal(ks[13], (B, cond_ch, T2 - dil2), jnp.float32)

    res2, skip2 = residual_block(x2, c2, params, dilation=dil2,
                                 skip_size=skip_size2, max_tile_t=128)
    jax.block_until_ready((res2, skip2))
    res2_ref, skip2_ref = _reference(x2, c2, params, dilation=dil2, skip_size=skip_size2)
    assert res2.shape == (B, res_ch, T2 - dil2) and skip2.shape == (B, skip_ch, skip_size2)
    assert jnp.allclose(res2, res2_ref, atol=2e-5, rtol=2e-5)
    assert jnp.allclose(skip2, skip2_ref, atol=2e-5, rtol=2e-5)

    # ---- test 3: bf16 HBM I/O (f32 accumulation), loose tolerance ------------
    xb = x.astype(jnp.bfloat16)
    cb = c.astype(jnp.bfloat16)
    res_b, skip_b = residual_block(xb, cb, params, dilation=dilation, skip_size=skip_size)
    jax.block_until_ready((res_b, skip_b))
    res_bref, skip_bref = _reference(xb.astype(jnp.float32), cb.astype(jnp.float32),
                                     params, dilation=dilation, skip_size=skip_size)
    assert res_b.dtype == jnp.bfloat16 and skip_b.dtype == jnp.bfloat16
    assert jnp.allclose(res_b.astype(jnp.float32), res_bref, atol=5e-2, rtol=5e-2)
    assert jnp.allclose(skip_b.astype(jnp.float32), skip_bref, atol=5e-2, rtol=5e-2)

    print("KERNEL_OK")
</pallas_src>

<mosaic_0001>
module attributes {stable_mosaic.version = 11 : i64} {
  func.func @_kernel_single(%arg0: i32, %arg1: i32, %arg2: memref<1x16x16xf32, #tpu.memory_space<vmem>>, %arg3: memref<1x12x14xf32, #tpu.memory_space<vmem>>, %arg4: memref<32x16xf32, #tpu.memory_space<vmem>>, %arg5: memref<32x16xf32, #tpu.memory_space<vmem>>, %arg6: memref<32x12xf32, #tpu.memory_space<vmem>>, %arg7: memref<32x1xf32, #tpu.memory_space<vmem>>, %arg8: memref<32x16xf32, #tpu.memory_space<vmem>>, %arg9: memref<32x1xf32, #tpu.memory_space<vmem>>, %arg10: memref<1x16x14xf32, #tpu.memory_space<vmem>>, %arg11: memref<1x16x14xf32, #tpu.memory_space<vmem>>) attributes {dimension_semantics = [#tpu.dimension_semantics<parallel>, #tpu.dimension_semantics<parallel>], iteration_bounds = array<i64: 2, 1>, scalar_prefetch = 0 : i64, scratch_operands = 0 : i64, tpu.core_type = #tpu.core_type<tc>, window_params = [{transform_indices = @transform_0, window_bounds = array<i64: 1, 16, 16>}, {transform_indices = @transform_1, window_bounds = array<i64: 1, 12, 14>}, {pipeline_mode = #tpu.pipeline_mode<synchronous>, transform_indices = @transform_2, window_bounds = array<i64: 32, 16>}, {pipeline_mode = #tpu.pipeline_mode<synchronous>, transform_indices = @transform_3, window_bounds = array<i64: 32, 16>}, {pipeline_mode = #tpu.pipeline_mode<synchronous>, transform_indices = @transform_4, window_bounds = array<i64: 32, 12>}, {pipeline_mode = #tpu.pipeline_mode<synchronous>, transform_indices = @transform_5, window_bounds = array<i64: 32, 1>}, {pipeline_mode = #tpu.pipeline_mode<synchronous>, transform_indices = @transform_6, window_bounds = array<i64: 32, 16>}, {pipeline_mode = #tpu.pipeline_mode<synchronous>, transform_indices = @transform_7, window_bounds = array<i64: 32, 1>}, {transform_indices = @transform_8, window_bounds = array<i64: 1, 16, 14>}, {transform_indices = @transform_9, window_bounds = array<i64: 1, 16, 14>}]} {
    %c0 = arith.constant 0 : index
    %c0_0 = arith.constant 0 : index
    %c0_1 = arith.constant 0 : index
    %0 = vector.load %arg2[%c0, %c0_0, %c0_1] : memref<1x16x16xf32, #tpu.memory_space<vmem>>, vector<1x16x16xf32>
    %1 = vector.shape_cast %0 : vector<1x16x16xf32> to vector<16x16xf32>
    %c0_2 = arith.constant 0 : index
    %c0_3 = arith.constant 0 : index
    %c0_4 = arith.constant 0 : index
    %2 = vector.load %arg3[%c0_2, %c0_3, %c0_4] : memref<1x12x14xf32, #tpu.memory_space<vmem>>, vector<1x12x14xf32>
    %3 = vector.shape_cast %2 : vector<1x12x14xf32> to vector<12x14xf32>
    %4 = vector.extract_strided_slice %1 {offsets = [0, 0], sizes = [16, 14], strides = [1, 1]} : vector<16x16xf32> to vector<16x14xf32>
    %5 = vector.extract_strided_slice %1 {offsets = [0, 2], sizes = [16, 14], strides = [1, 1]} : vector<16x16xf32> to vector<16x14xf32>
    %c0_5 = arith.constant 0 : index
    %c0_6 = arith.constant 0 : index
    %6 = vector.load %arg4[%c0_5, %c0_6] : memref<32x16xf32, #tpu.memory_space<vmem>>, vector<32x16xf32>
    %cst = arith.constant dense<0.000000e+00> : vector<32x14xf32>
    %7 = tpu.matmul %6, %4, %cst {dimension_numbers = #tpu.dot_dimension_numbers<[1], [0], [0], [1], [0, 0, 1, 1], [], []>} : vector<32x16xf32>, vector<16x14xf32>, vector<32x14xf32> -> vector<32x14xf32>
    %c0_7 = arith.constant 0 : index
    %c0_8 = arith.constant 0 : index
    %8 = vector.load %arg5[%c0_7, %c0_8] : memref<32x16xf32, #tpu.memory_space<vmem>>, vector<32x16xf32>
    %cst_9 = arith.constant dense<0.000000e+00> : vector<32x14xf32>
    %9 = tpu.matmul %8, %5, %cst_9 {dimension_numbers = #tpu.dot_dimension_numbers<[1], [0], [0], [1], [0, 0, 1, 1], [], []>} : vector<32x16xf32>, vector<16x14xf32>, vector<32x14xf32> -> vector<32x14xf32>
    %10 = arith.addf %7, %9 : vector<32x14xf32>
    %c0_10 = arith.constant 0 : index
    %c0_11 = arith.constant 0 : index
    %11 = vector.load %arg6[%c0_10, %c0_11] : memref<32x12xf32, #tpu.memory_space<vmem>>, vector<32x12xf32>
    %cst_12 = arith.constant dense<0.000000e+00> : vector<32x14xf32>
    %12 = tpu.matmul %11, %3, %cst_12 {dimension_numbers = #tpu.dot_dimension_numbers<[1], [0], [0], [1], [0, 0, 1, 1], [], []>} : vector<32x12xf32>, vector<12x14xf32>, vector<32x14xf32> -> vector<32x14xf32>
    %13 = arith.addf %10, %12 : vector<32x14xf32>
    %c0_13 = arith.constant 0 : index
    %c0_14 = arith.constant 0 : index
    %14 = vector.load %arg7[%c0_13, %c0_14] : memref<32x1xf32, #tpu.memory_space<vmem>>, vector<32x1xf32>
    %15 = vector.broadcast %14 : vector<32x1xf32> to vector<32x14xf32>
    %16 = arith.addf %13, %15 : vector<32x14xf32>
    %17 = vector.extract_strided_slice %16 {offsets = [0, 0], sizes = [16, 14], strides = [1, 1]} : vector<32x14xf32> to vector<16x14xf32>
    %18 = vector.extract_strided_slice %16 {offsets = [16, 0], sizes = [16, 14], strides = [1, 1]} : vector<32x14xf32> to vector<16x14xf32>
    %19 = math.tanh %18 : vector<16x14xf32>
    %cst_15 = arith.constant 5.000000e-01 : f32
    %20 = vector.broadcast %cst_15 : f32 to vector<16x14xf32>
    %21 = arith.mulf %20, %17 : vector<16x14xf32>
    %22 = math.tanh %21 : vector<16x14xf32>
    %cst_16 = arith.constant 1.000000e+00 : f32
    %23 = vector.broadcast %cst_16 : f32 to vector<16x14xf32>
    %24 = arith.addf %22, %23 : vector<16x14xf32>
    %cst_17 = arith.constant 5.000000e-01 : f32
    %25 = vector.broadcast %cst_17 : f32 to vector<16x14xf32>
    %26 = arith.mulf %25, %24 : vector<16x14xf32>
    %27 = arith.mulf %19, %26 : vector<16x14xf32>
    %c0_18 = arith.constant 0 : index
    %c0_19 = arith.constant 0 : index
    %28 = vector.load %arg8[%c0_18, %c0_19] : memref<32x16xf32, #tpu.memory_space<vmem>>, vector<32x16xf32>
    %cst_20 = arith.constant dense<0.000000e+00> : vector<32x14xf32>
    %29 = tpu.matmul %28, %27, %cst_20 {dimension_numbers = #tpu.dot_dimension_numbers<[1], [0], [0], [1], [0, 0, 1, 1], [], []>} : vector<32x16xf32>, vector<16x14xf32>, vector<32x14xf32> -> vector<32x14xf32>
    %c0_21 = arith.constant 0 : index
    %c0_22 = arith.constant 0 : index
    %30 = vector.load %arg9[%c0_21, %c0_22] : memref<32x1xf32, #tpu.memory_space<vmem>>, vector<32x1xf32>
    %31 = vector.broadcast %30 : vector<32x1xf32> to vector<32x14xf32>
    %32 = arith.addf %29, %31 : vector<32x14xf32>
    %33 = vector.extract_strided_slice %32 {offsets = [0, 0], sizes = [16, 14], strides = [1, 1]} : vector<32x14xf32> to vector<16x14xf32>
    %34 = arith.addf %33, %5 : vector<16x14xf32>
    %c0_23 = arith.constant 0 : index
    %c0_24 = arith.constant 0 : index
    %c0_25 = arith.constant 0 : index
    %35 = vector.load %arg10[%c0_23, %c0_24, %c0_25] : memref<1x16x14xf32, #tpu.memory_space<vmem>>, vector<1x16x14xf32>
    %36 = vector.shape_cast %35 : vector<1x16x14xf32> to vector<16x14xf32>
    %37 = vector.shape_cast %34 : vector<16x14xf32> to vector<1x16x14xf32>
    tpu.vector_store %arg10[%c0_23, %c0_24, %c0_25], %37 {strides = array<i32>} : memref<1x16x14xf32, #tpu.memory_space<vmem>>, vector<1x16x14xf32>,
    %38 = vector.extract_strided_slice %32 {offsets = [16, 0], sizes = [16, 14], strides = [1, 1]} : vector<32x14xf32> to vector<16x14xf32>
    %c0_26 = arith.constant 0 : index
    %c0_27 = arith.constant 0 : index
    %c0_28 = arith.constant 0 : index
    %39 = vector.load %arg11[%c0_26, %c0_27, %c0_28] : memref<1x16x14xf32, #tpu.memory_space<vmem>>, vector<1x16x14xf32>
    %40 = vector.shape_cast %39 : vector<1x16x14xf32> to vector<16x14xf32>
    %41 = vector.shape_cast %38 : vector<16x14xf32> to vector<1x16x14xf32>
    tpu.vector_store %arg11[%c0_26, %c0_27, %c0_28], %41 {strides = array<i32>} : memref<1x16x14xf32, #tpu.memory_space<vmem>>, vector<1x16x14xf32>,
    return
  }
  func.func @transform_0(%arg0: i32, %arg1: i32) -> (i32, i32, i32) {
    %c0_i32 = arith.constant 0 : i32
    %c0_i32_0 = arith.constant 0 : i32
    %c0_i32_1 = arith.constant 0 : i32
    return %arg0, %c0_i32, %c0_i32_0 : i32, i32, i32
  }
  func.func @transform_1(%arg0: i32, %arg1: i32) -> (i32, i32, i32) {
    %c0_i32 = arith.constant 0 : i32
    %c0_i32_0 = arith.constant 0 : i32
    return %arg0, %c0_i32, %arg1 : i32, i32, i32
  }
  func.func @transform_2(%arg0: i32, %arg1: i32) -> (i32, i32) {
    %c0_i32 = arith.constant 0 : i32
    %c0_i32_0 = arith.constant 0 : i32
    %c0_i32_1 = arith.constant 0 : i32
    return %c0_i32, %c0_i32_0 : i32, i32
  }
  func.func @transform_3(%arg0: i32, %arg1: i32) -> (i32, i32) {
    %c0_i32 = arith.constant 0 : i32
    %c0_i32_0 = arith.constant 0 : i32
    %c0_i32_1 = arith.constant 0 : i32
    return %c0_i32, %c0_i32_0 : i32, i32
  }
  func.func @transform_4(%arg0: i32, %arg1: i32) -> (i32, i32) {
    %c0_i32 = arith.constant 0 : i32
    %c0_i32_0 = arith.constant 0 : i32
    %c0_i32_1 = arith.constant 0 : i32
    return %c0_i32, %c0_i32_0 : i32, i32
  }
  func.func @transform_5(%arg0: i32, %arg1: i32) -> (i32, i32) {
    %c0_i32 = arith.constant 0 : i32
    %c0_i32_0 = arith.constant 0 : i32
    %c0_i32_1 = arith.constant 0 : i32
    return %c0_i32, %c0_i32_0 : i32, i32
  }
  func.func @transform_6(%arg0: i32, %arg1: i32) -> (i32, i32) {
    %c0_i32 = arith.constant 0 : i32
    %c0_i32_0 = arith.constant 0 : i32
    %c0_i32_1 = arith.constant 0 : i32
    return %c0_i32, %c0_i32_0 : i32, i32
  }
  func.func @transform_7(%arg0: i32, %arg1: i32) -> (i32, i32) {
    %c0_i32 = arith.constant 0 : i32
    %c0_i32_0 = arith.constant 0 : i32
    %c0_i32_1 = arith.constant 0 : i32
    return %c0_i32, %c0_i32_0 : i32, i32
  }
  func.func @transform_8(%arg0: i32, %arg1: i32) -> (i32, i32, i32) {
    %c0_i32 = arith.constant 0 : i32
    %c0_i32_0 = arith.constant 0 : i32
    return %arg0, %c0_i32, %arg1 : i32, i32, i32
  }
  func.func @transform_9(%arg0: i32, %arg1: i32) -> (i32, i32, i32) {
    %c0_i32 = arith.constant 0 : i32
    %c0_i32_0 = arith.constant 0 : i32
    return %arg0, %c0_i32, %arg1 : i32, i32, i32
  }
}

</mosaic_0001>

<bundles_post_ra>
// kernel: tpu_custom_call.1
= control target key start
LH: loop header
LB: loop body
LE: loop exit
PB: predicated region body
PF: predicated region fallthrough
CT: control target
= control target key end

     0   :  { %s969_s30 = smov 0   ;;  %s971_s10 = smov 0   ;;  %s1114_s0 = inlined_call_operand.vmem [shape: f32[2,16,16], index: 0, kind: input, shape index: {}]   ;;  %s1115_s1 = inlined_call_operand.vmem [shape: f32[2,12,14], index: 1, kind: input, shape index: {}]   ;;  %s1116_s2 = inlined_call_operand.vmem [shape: f32[32,16], index: 2, kind: input, shape index: {}]   ;;  %s1117_s3 = inlined_call_operand.vmem [shape: f32[32,16], index: 3, kind: input, shape index: {}]   ;;  %s1118_s4 = inlined_call_operand.vmem [shape: f32[32,12], index: 4, kind: input, shape index: {}]   ;;  %s1119_s5 = inlined_call_operand.vmem [shape: f32[32,1], index: 5, kind: input, shape index: {}]   ;;  %s1120_s6 = inlined_call_operand.vmem [shape: f32[32,16], index: 6, kind: input, shape index: {}]   ;;  %s1121_s7 = inlined_call_operand.vmem [shape: f32[32,1], index: 7, kind: input, shape index: {}]   ;;  %s1122_s8 = inlined_call_operand.vmem [shape: f32[2,16,14], index: 8, kind: output, shape index: {0}]   ;;  %s1123_s9 = inlined_call_operand.vmem [shape: f32[2,16,14], index: 9, kind: output, shape index: {1}]  }
   0x1   :  { %s973_s11 = smov 0  }
   0x2 LB: > { %s32_s12 = sadd.s32 1, %s911_s10  ;;  %p824_p0 = scmp.ge.s32.totalorder %s915_s11, 1  ;;  %s915_s11 = sphi %s973_s11, %s20_s11   ;;  %s911_s10 = sphi %s971_s10, %s1125_s10   ;;  %s907_s30 = sphi %s969_s30, %s1124_s30  }
   0x3   : > { %p34_p1 = scmp.ge.s32.totalorder %s32_s12, 2  ;;  %p321_p2 = scmp.lt.s32.totalorder %s915_s11, 3 }
   0x5   : > { %s1127_s12 = smov (%p34_p1, %s32_s12), 0  ;;  %p322_p3 = pnand %p824_p0, %p321_p2 }
   0x6   : > { %p376_p4 = scmp.lt.s32.totalorder (!%p322_p3), %s907_s30, 1  ;;  %s917_s17 = smov (!%p322_p3), 126  }
   0x7   : > { %325 = sbr.rel (%p322_p3) target bundleno = 467 (0x1d3), region = 52 }
   0xc   : > { %s1129_s30 = smov (!%p376_p4, %s907_s30), 1  ;;  %vm525_vm0 = vcmask 1043456   ;;  %v508_v4 = vld [vmem:[%s1118_s4] sm:$0xff]  ;;  %vm512_vm1 = vcmask 97280   ;;  %vm425_vm2 = vcmask 130048   ;;  %v563_v6 = vld [vmem:[%s1119_s5 + $0x8] sm:$0xff] }
   0xd   : > { %s987_s13 = sshll.u32 %s1129_s30, 4  ;;  %v409_v5 = vld [vmem:[%s1116_s2] sm:$0xff]  ;;  %v509_v7 = vld [vmem:[%s1118_s4 + $0x8] sm:$0xff]  ;;  %v918_v8 = vmov 0   ;;  %v510_v11 = vld [vmem:[%s1118_s4 + $0x10] sm:$0xff]  ;;  %vm673_vm3 = vcmask 113664  }
   0xe   : > { %s380_s16 = scalar_lea.vmem %s1114_s0, %s987_s13  ;;  %s388_s20 = scalar_lea.vmem %s1115_s1, %s987_s13  ;;  %882 = vset.pattern.permute.xlu1 %v918_v8  ;;  %883 = vset.pattern.permute.xlu2 %v918_v8  ;;  %v410_v9 = vld [vmem:[%s1116_s2 + $0x8] sm:$0xff]  ;;  %v562_v10 = vld [vmem:[%s1119_s5] sm:$0xff]  ;;  %v411_v12 = vld [vmem:[%s1116_s2 + $0x10] sm:$0xff] }
   0xf   : > { %v406_v0 = vld [vmem:[%s380_s16 + $0x8] sm:$0xff]  ;;  %v405_v1 = vld [vmem:[%s380_s16] sm:$0xff]  ;;  %573 = vperm.xlu1 %882, %v563_v6   ;;  %884 = vset.pattern.permute.xlu0 %v918_v8  ;;  %v511_v14 = vld [vmem:[%s1118_s4 + $0x18] sm:$0xff]  ;;  %s404_s23 = scalar_lea.vmem %s1123_s9, %s987_s13 }
  0x10   : > { %421 = vrot.lane.b32.xlu0 %v406_v0, %s917_s17  ;;  %493 = vmatpush.msra.mxu1 %v406_v0  ;;  %v408_v2 = vld [vmem:[%s388_s20 + $0x8] sm:$0xf]  ;;  %v407_v3 = vld [vmem:[%s388_s20] sm:$0xff]  ;;  %v412_v16 = vld [vmem:[%s1116_s2 + $0x18] sm:$0xff]  ;;  %s396_s20 = scalar_lea.vmem %s1122_s8, %s987_s13 }
  0x11   : > { %841 = vmatpush.msk.msra.mxu2 %vm525_vm0, %v408_v2  ;;  %v607_v13 = vld [vmem:[%s1121_s7 + $0x8] sm:$0xff]  ;;  %v609_v17 = vld [vmem:[%s1121_s7 + $0x18] sm:$0xff]  ;;  %v413_v19 = vld [vmem:[%s1117_s3] sm:$0xff] }
  0x12   : > { %494 = vmatpush.msra.mxu1 %v405_v1  ;;  %v565_v18 = vld [vmem:[%s1119_s5 + $0x18] sm:$0xff]  ;;  %v564_v21 = vld [vmem:[%s1119_s5 + $0x10] sm:$0xff]  ;;  %v414_v22 = vld [vmem:[%s1117_s3 + $0x8] sm:$0xff] }
  0x13   : > { %544 = vmatpush.msra.mxu2 %v407_v3  ;;  %837 = vmatmul.msk.f32.vlgmr.msra.gmra.mxu1 %vm425_vm2, %v409_v5  ;;  %v608_v23 = vld [vmem:[%s1121_s7 + $0x10] sm:$0xff]  ;;  %v416_v25 = vld [vmem:[%s1117_s3 + $0x18] sm:$0xff]  ;;  %v606_v55 = vld [vmem:[%s1121_s7] sm:$0xff] }
  0x14   : > { %842 = vmatmul.msk.f32.vlgmr.msra.gmra.mxu2 %vm512_vm1, %v508_v4  ;;  %583 = vperm.xlu2 %883, %v565_v18   ;;  %v415_v24 = vld [vmem:[%s1117_s3 + $0x10] sm:$0xff]  ;;  %v602_v3 = vld [vmem:[%s1120_s6] sm:$0xff]  ;;  %v603_v4 = vld [vmem:[%s1120_s6 + $0x8] sm:$0xff] }
  0x15   : > { %v604_v5 = vld [vmem:[%s1120_s6 + $0x10] sm:$0xff]  ;;  %v605_v6 = vld [vmem:[%s1120_s6 + $0x18] sm:$0xff] }
  0x17   : > { %568 = vperm.xlu1 %882, %v562_v10  }
  0x18   : > { %419 = vrot.lane.b32.xlu0 %v405_v1, %s917_s17 }
  0x1b   : > { %838 = vmatmul.msk.f32.gmra.mxu1 %vm425_vm2, %v410_v9 }
  0x1c   : > { %843 = vmatmul.msk.f32.gmra.mxu2 %vm512_vm1, %v509_v7  ;;  %578 = vperm.xlu2 %883, %v564_v21  }
  0x1f   : > { %617 = vperm.xlu1 %882, %v607_v13  }
  0x20   : > { %612 = vperm.xlu0 %884, %v606_v55  }
  0x23   : > { %839 = vmatmul.msk.f32.gmra.mxu1 %vm425_vm2, %v411_v12 }
  0x24   : > { %844 = vmatmul.msk.f32.gmra.mxu2 %vm512_vm1, %v510_v11  ;;  %622 = vperm.xlu2 %883, %v608_v23  }
  0x27   : > { %627 = vperm.xlu1 %882, %v609_v17  }
  0x2b   : > { %840 = vmatmul.msk.f32.gmra.mxu1 %vm425_vm2, %v412_v16 }
  0x2c   : > { %845 = vmatmul.msk.f32.gmra.mxu2 %vm512_vm1, %v511_v14 }
  0x6e   : > { %v584_v39 = vpop.permute.xlu2 %583 }
  0x76   : > { %v579_v51 = vpop.permute.xlu2 %578 }
  0x7e   : > { %v623_v16 = vpop.permute.xlu2 %622 }
  0x81   : > { %v574_v31 = vpop.permute.xlu1 %573 }
  0x82   : > { %v1034_v15 = vpop.permute.xlu0 %421 }
  0x83   : > { %452 = vmatpush.msra.mxu0 %v1034_v15 }
  0x89   : > { %v569_v41 = vpop.permute.xlu1 %568 }
  0x8a   : > { %v1050_v20 = vpop.permute.xlu0 %419 }
  0x8b   : > { %453 = vmatpush.msra.mxu0 %v1050_v20 }
  0x8c   : > { %833 = vmatmul.msk.f32.vlgmr.msra.gmra.mxu0 %vm425_vm2, %v413_v19 }
  0x90   : > { %v496_v26 = vpop.f32.mrf.mxu1 }
  0x91   : > { %v618_v11 = vpop.permute.xlu1 %617 }
  0x92   : > { %v613_v7 = vpop.permute.xlu0 %612 }
  0x94   : > { %834 = vmatmul.msk.f32.gmra.mxu0 %vm425_vm2, %v414_v22 }
  0x97   : > { %v546_v27 = vpop.f32.mrf.mxu2 }
  0x98   : > { %v499_v29 = vpop.f32.mrf.mxu1 }
  0x99   : > { %v628_v19 = vpop.permute.xlu1 %627 }
  0x9c   : > { %835 = vmatmul.msk.f32.gmra.mxu0 %vm425_vm2, %v415_v24 }
  0x9f   : > { %v549_v30 = vpop.f32.mrf.mxu2 }
  0xa0   : > { %v502_v36 = vpop.f32.mrf.mxu1 }
  0xa4   : > { %836 = vmatmul.msk.f32.gmra.mxu0 %vm425_vm2, %v416_v25 }
  0xa7   : > { %v552_v38 = vpop.f32.mrf.mxu2 }
  0xa8   : > { %v505_v48 = vpop.f32.mrf.mxu1 }
  0xaf   : > { %v555_v50 = vpop.f32.mrf.mxu2 }
 0x109   : > { %v455_v28 = vpop.f32.mrf.mxu0 }
 0x10a   : > { %v497_v33 = vadd.f32 %v496_v26, %v455_v28 }
 0x10c   : > { %v558_v37 = vadd.f32 %v546_v27, %v497_v33 }
 0x10e   : > { %v586_v43 = vadd.f32 %v569_v41, %v558_v37 }
 0x110   : > { %v592_v46 = vmul.f32 0.5, %v586_v43 }
 0x111   : > { %v458_v32 = vpop.f32.mrf.mxu0 }
 0x112   : > { %v500_v34 = vadd.f32 %v499_v29, %v458_v32 }
 0x114   : > { %v559_v35 = vadd.f32 %v549_v30, %v500_v34 }
 0x116   : > { %v587_v40 = vadd.f32 %v574_v31, %v559_v35 }
 0x118   : > { %v593_v45 = vmul.f32 0.5, %v587_v40 }
 0x119   : > { %v461_v42 = vpop.f32.mrf.mxu0 }
 0x11a   : > { %v503_v44 = vadd.f32 %v502_v36, %v461_v42  ;;  %885 = vtanh.f32 %v593_v45 }
 0x11b   : > { %887 = vtanh.f32 %v592_v46 }
 0x11c   : > { %v560_v47 = vadd.f32 %v552_v38, %v503_v44 }
 0x11e   : > { %v588_v53 = vadd.f32 %v579_v51, %v560_v47 }
 0x120   : > { %v886_v56 = vpop.eup %885  ;;  %889 = vtanh.f32 %v588_v53 }
 0x121   : > { %v464_v49 = vpop.f32.mrf.mxu0  ;;  %v888_v58 = vpop.eup %887  ;;  %v597_v59 = vadd.f32 1.0, %v886_v56 }
 0x122   : > { %v506_v52 = vadd.f32 %v505_v48, %v464_v49  ;;  %v596_v60 = vadd.f32 1.0, %v888_v58 }
 0x123   : > { %v599_v62 = vmul.f32 0.5, %v597_v59 }
 0x124   : > { %v561_v54 = vadd.f32 %v555_v50, %v506_v52  ;;  %v598_v1 = vmul.f32 0.5, %v596_v60 }
 0x126   : > { %v589_v57 = vadd.f32 %v584_v39, %v561_v54  ;;  %v890_v61 = vpop.eup %889 }
 0x127   : > { %v600_v2 = vmul.f32 %v890_v61, %v598_v1 }
 0x128   : > { %891 = vtanh.f32 %v589_v57 }
 0x12e   : > { %v892_v63 = vpop.eup %891 }
 0x12f   : > { %v601_v0 = vmul.f32 %v892_v63, %v599_v62 }
 0x131   : > { %656 = vmatpush.msra.mxu3 %v601_v0 }
 0x133   : > { %657 = vmatpush.msra.mxu3 %v600_v2 }
 0x134   : > { %846 = vmatmul.msk.f32.vlgmr.msra.gmra.mxu3 %vm425_vm2, %v602_v3 }
 0x13c   : > { %847 = vmatmul.msk.f32.gmra.mxu3 %vm425_vm2, %v603_v4 }
 0x144   : > { %848 = vmatmul.msk.f32.gmra.mxu3 %vm425_vm2, %v604_v5 }
 0x14c   : > { %849 = vmatmul.msk.f32.gmra.mxu3 %vm425_vm2, %v605_v6 }
 0x1b7   : > { %v659_v8 = vpop.f32.mrf.mxu3 }
 0x1b8   : > { %v660_v9 = vadd.f32 %v659_v8, %v613_v7 }
 0x1ba   : > { %v671_v10 = vadd.f32 %v660_v9, %v1050_v20 }
 0x1bc   : > { %674 = vst.msk [vmem:[%s396_s20] sm:$0xff] %vm673_vm3, %v671_v10 }
 0x1bf   : > { %v662_v12 = vpop.f32.mrf.mxu3 }
 0x1c0   : > { %v663_v13 = vadd.f32 %v662_v12, %v618_v11 }
 0x1c2   : > { %v672_v14 = vadd.f32 %v663_v13, %v1034_v15 }
 0x1c4   : > { %675 = vst.msk [vmem:[%s396_s20 + $0x8] sm:$0xff] %vm673_vm3, %v672_v14 }
 0x1c7   : > { %v665_v17 = vpop.f32.mrf.mxu3 }
 0x1c8   : > { %v666_v18 = vadd.f32 %v665_v17, %v623_v16 }
 0x1ca   : > { %676 = vst.msk [vmem:[%s404_s23] sm:$0xff] %vm673_vm3, %v666_v18 }
 0x1cf   : > { %v668_v20 = vpop.f32.mrf.mxu3 }
 0x1d0   : > { %v669_v21 = vadd.f32 %v668_v20, %v628_v19 }
 0x1d2   : > { %677 = vst.msk [vmem:[%s404_s23 + $0x8] sm:$0xff] %vm673_vm3, %v669_v21 }
 0x1d3 PF: > { %s20_s11 = sadd.s32 1, %s915_s11   ;;  %s1124_s30 = smov %s911_s10 }
 0x1d4   : > { %p17_p5 = scmp.ge.s32.totalorder %s20_s11, 4   ;;  %s1125_s10 = smov %s1127_s12 }
 0x1d6   :  { %19 = sbr.rel (!%p17_p5) target bundleno = 2 (0x2), region = 97 }

</bundles_post_ra>
